<compile_context>
chip_gen: v7x
topology: tpu7x:2x2x1
jax: 0.10.0
libtpu: 0.0.40
codegen_flags: <defaults>
</compile_context>

<pallas_src>
import functools

import jax
import jax.numpy as jnp
from jax.experimental import pallas as pl
from jax.experimental.pallas import tpu as pltpu


def _spatial_attention_kernel(x_ref, w1_ref, b1_ref, w2_ref, b2_ref, o_ref):
    # x_ref : (1, C, t_hw)    -- channels on sublanes, spatial pixels on lanes
    # w1_ref: (Cp, C)          b1_ref: (Cp, 1)      (Cp = 128, padded hidden)
    # w2_ref: (1, Cp)          b2_ref: (1, 1)
    # o_ref : (1, 1, t_hw)
    x = x_ref[0].astype(jnp.float32)                       # (C, t_hw)

    # act0: ReLU (VPU)
    h = jnp.maximum(x, 0.0)

    # conv1 (1x1): channel-dim matmul on the MXU, f32 accumulation
    h1 = jnp.dot(w1_ref[...].astype(jnp.float32), h,
                 preferred_element_type=jnp.float32)       # (Cp, t_hw)
    h1 = h1 + b1_ref[...].astype(jnp.float32)              # lane-broadcast bias

    # act1: ReLU (VPU)
    h1 = jnp.maximum(h1, 0.0)

    # conv2 (1x1): (1, Cp) @ (Cp, t_hw) -> (1, t_hw)
    s = jnp.dot(w2_ref[...].astype(jnp.float32), h1,
                preferred_element_type=jnp.float32)
    s = s + b2_ref[...].astype(jnp.float32)

    # Softplus(beta=1, threshold=20): PyTorch semantics (linear above the
    # threshold).  Clamp the exp argument so no inf intermediate is formed.
    sp = jnp.log1p(jnp.exp(jnp.minimum(s, 20.0)))          # EUP exp/log
    out = jnp.where(s > 20.0, s, sp)

    o_ref[0] = out.astype(o_ref.dtype)


@functools.partial(jax.jit, static_argnames=())
def spatial_attention_2d(x, w1, b1, w2, b2):
    """x: (B, C, H, W) NCHW feature map. Returns (B, 1, H, W) attention scores."""
    B, C, H, W = x.shape
    C_mid = w1.shape[0]          # 126 in the reference module
    HW = H * W

    # Contiguous (free) reshape of the big tensor only -- no transposes.
    x3 = x.reshape(B, C, HW)

    # Pad the tiny weight/bias tensors so the hidden width is a multiple of 8
    # (126 -> 128): alignment-clean sublane tiles, zero math impact.
    Cp = ((C_mid + 7) // 8) * 8
    pad = Cp - C_mid
    w1p = jnp.pad(w1, ((0, pad), (0, 0))) if pad else w1           # (Cp, C)
    b1p = jnp.pad(b1, ((0, pad),)).reshape(Cp, 1)                  # (Cp, 1)
    w2p = jnp.pad(w2, ((0, 0), (0, pad))) if pad else w2           # (1, Cp)
    b2p = b2.reshape(1, 1)

    # Lane-dense spatial tile.  If HW is a multiple of 128 use tiles of up to
    # 4096 lanes (<= 2 MiB f32 hidden activation per step); otherwise take the
    # full extent (legally bypasses the 128-lane divisibility rule).  Partial
    # tail tiles are safe: all compute is lane-local (channel contraction
    # only) and Pallas masks the out-of-bounds writeback.
    if HW % 128 == 0:
        t_hw = min(HW, 4096)
    else:
        t_hw = HW

    grid = (B, pl.cdiv(HW, t_hw))

    out3 = pl.pallas_call(
        _spatial_attention_kernel,
        out_shape=jax.ShapeDtypeStruct((B, 1, HW), x.dtype),
        grid=grid,
        in_specs=[
            pl.BlockSpec((1, C, t_hw), lambda b, j: (b, 0, j)),   # features
            pl.BlockSpec((Cp, C),      lambda b, j: (0, 0)),      # conv1 weight
            pl.BlockSpec((Cp, 1),      lambda b, j: (0, 0)),      # conv1 bias
            pl.BlockSpec((1, Cp),      lambda b, j: (0, 0)),      # conv2 weight
            pl.BlockSpec((1, 1),       lambda b, j: (0, 0)),      # conv2 bias
        ],
        out_specs=pl.BlockSpec((1, 1, t_hw), lambda b, j: (b, 0, j)),
        compiler_params=pltpu.CompilerParams(
            dimension_semantics=("parallel", "parallel"),
        ),
    )(x3, w1p, b1p, w2p, b2p)

    return out3.reshape(B, 1, H, W)


def _reference(x, w1, b1, w2, b2):
    """Pure-JAX reference matching the PyTorch module."""
    h = jnp.maximum(x, 0.0)
    h = jnp.einsum("oc,bchw->bohw", w1, h) + b1[None, :, None, None]
    h = jnp.maximum(h, 0.0)
    s = jnp.einsum("oc,bchw->bohw", w2, h) + b2[None, :, None, None]
    return jnp.where(s > 20.0, s, jnp.log1p(jnp.exp(s)))


if __name__ == "__main__":
    key = jax.random.PRNGKey(0)
    kx, k1, k2, k3, k4 = jax.random.split(key, 5)

    B, C, H, W = 2, 4, 16, 16        # small NCHW feature map
    C_MID = 126                      # matches nn.Conv2d(in_c, 126, 1, 1)

    x = jax.random.normal(kx, (B, C, H, W), dtype=jnp.float32)
    w1 = jax.random.normal(k1, (C_MID, C), dtype=jnp.float32) * 0.1
    b1 = jax.random.normal(k2, (C_MID,), dtype=jnp.float32) * 0.1
    w2 = jax.random.normal(k3, (1, C_MID), dtype=jnp.float32) * 0.1
    b2 = jax.random.normal(k4, (1,), dtype=jnp.float32) * 0.1

    y = spatial_attention_2d(x, w1, b1, w2, b2)
    jax.block_until_ready(y)

    y_ref = _reference(x, w1, b1, w2, b2)
    assert y.shape == (B, 1, H, W), y.shape
    assert y.dtype == x.dtype
    assert jnp.allclose(y, y_ref, atol=1e-5, rtol=1e-5), float(
        jnp.max(jnp.abs(y - y_ref))
    )
    print("KERNEL_OK")
</pallas_src>

<mosaic_0001>
module attributes {stable_mosaic.version = 11 : i64} {
  func.func @_spatial_attention_kernel(%arg0: i32, %arg1: i32, %arg2: memref<1x4x256xf32, #tpu.memory_space<vmem>>, %arg3: memref<128x4xf32, #tpu.memory_space<vmem>>, %arg4: memref<128x1xf32, #tpu.memory_space<vmem>>, %arg5: memref<1x128xf32, #tpu.memory_space<vmem>>, %arg6: memref<1x1xf32, #tpu.memory_space<vmem>>, %arg7: memref<1x1x256xf32, #tpu.memory_space<vmem>>) attributes {dimension_semantics = [#tpu.dimension_semantics<parallel>, #tpu.dimension_semantics<parallel>], iteration_bounds = array<i64: 2, 1>, scalar_prefetch = 0 : i64, scratch_operands = 0 : i64, tpu.core_type = #tpu.core_type<tc>, window_params = [{transform_indices = @transform_0, window_bounds = array<i64: 1, 4, 256>}, {pipeline_mode = #tpu.pipeline_mode<synchronous>, transform_indices = @transform_1, window_bounds = array<i64: 128, 4>}, {pipeline_mode = #tpu.pipeline_mode<synchronous>, transform_indices = @transform_2, window_bounds = array<i64: 128, 1>}, {pipeline_mode = #tpu.pipeline_mode<synchronous>, transform_indices = @transform_3, window_bounds = array<i64: 1, 128>}, {pipeline_mode = #tpu.pipeline_mode<synchronous>, transform_indices = @transform_4, window_bounds = array<i64: 1, 1>}, {transform_indices = @transform_5, window_bounds = array<i64: 1, 1, 256>}]} {
    %c0 = arith.constant 0 : index
    %c0_0 = arith.constant 0 : index
    %c0_1 = arith.constant 0 : index
    %0 = vector.load %arg2[%c0, %c0_0, %c0_1] : memref<1x4x256xf32, #tpu.memory_space<vmem>>, vector<1x4x256xf32>
    %1 = vector.shape_cast %0 : vector<1x4x256xf32> to vector<4x256xf32>
    %cst = arith.constant 0.000000e+00 : f32
    %2 = vector.broadcast %cst : f32 to vector<4x256xf32>
    %3 = arith.maximumf %1, %2 : vector<4x256xf32>
    %c0_2 = arith.constant 0 : index
    %c0_3 = arith.constant 0 : index
    %4 = vector.load %arg3[%c0_2, %c0_3] : memref<128x4xf32, #tpu.memory_space<vmem>>, vector<128x4xf32>
    %cst_4 = arith.constant dense<0.000000e+00> : vector<128x256xf32>
    %5 = tpu.matmul %4, %3, %cst_4 {dimension_numbers = #tpu.dot_dimension_numbers<[1], [0], [0], [1], [0, 0, 1, 1], [], []>} : vector<128x4xf32>, vector<4x256xf32>, vector<128x256xf32> -> vector<128x256xf32>
    %c0_5 = arith.constant 0 : index
    %c0_6 = arith.constant 0 : index
    %6 = vector.load %arg4[%c0_5, %c0_6] : memref<128x1xf32, #tpu.memory_space<vmem>>, vector<128x1xf32>
    %7 = vector.broadcast %6 : vector<128x1xf32> to vector<128x256xf32>
    %8 = arith.addf %5, %7 : vector<128x256xf32>
    %cst_7 = arith.constant 0.000000e+00 : f32
    %9 = vector.broadcast %cst_7 : f32 to vector<128x256xf32>
    %10 = arith.maximumf %8, %9 : vector<128x256xf32>
    %c0_8 = arith.constant 0 : index
    %c0_9 = arith.constant 0 : index
    %11 = vector.load %arg5[%c0_8, %c0_9] : memref<1x128xf32, #tpu.memory_space<vmem>>, vector<1x128xf32>
    %cst_10 = arith.constant dense<0.000000e+00> : vector<1x256xf32>
    %12 = tpu.matmul %11, %10, %cst_10 {dimension_numbers = #tpu.dot_dimension_numbers<[1], [0], [0], [1], [0, 0, 1, 1], [], []>} : vector<1x128xf32>, vector<128x256xf32>, vector<1x256xf32> -> vector<1x256xf32>
    %c0_11 = arith.constant 0 : index
    %c0_12 = arith.constant 0 : index
    %13 = vector.load %arg6[%c0_11, %c0_12] : memref<1x1xf32, #tpu.memory_space<vmem>>, vector<1x1xf32>
    %14 = vector.broadcast %13 : vector<1x1xf32> to vector<1x256xf32>
    %15 = arith.addf %12, %14 : vector<1x256xf32>
    %cst_13 = arith.constant 2.000000e+01 : f32
    %16 = vector.broadcast %cst_13 : f32 to vector<1x256xf32>
    %17 = arith.minimumf %15, %16 : vector<1x256xf32>
    %18 = math.exp %17 : vector<1x256xf32>
    %19 = math.log1p %18 : vector<1x256xf32>
    %cst_14 = arith.constant 2.000000e+01 : f32
    %20 = vector.broadcast %cst_14 : f32 to vector<1x256xf32>
    %21 = arith.cmpf ogt, %15, %20 : vector<1x256xf32>
    %22 = arith.select %21, %15, %19 : vector<1x256xi1>, vector<1x256xf32>
    %c0_15 = arith.constant 0 : index
    %c0_16 = arith.constant 0 : index
    %c0_17 = arith.constant 0 : index
    %23 = vector.load %arg7[%c0_15, %c0_16, %c0_17] : memref<1x1x256xf32, #tpu.memory_space<vmem>>, vector<1x1x256xf32>
    %24 = vector.shape_cast %23 : vector<1x1x256xf32> to vector<1x256xf32>
    %25 = vector.shape_cast %22 : vector<1x256xf32> to vector<1x1x256xf32>
    tpu.vector_store %arg7[%c0_15, %c0_16, %c0_17], %25 {strides = array<i32>} : memref<1x1x256xf32, #tpu.memory_space<vmem>>, vector<1x1x256xf32>,
    return
  }
  func.func @transform_0(%arg0: i32, %arg1: i32) -> (i32, i32, i32) {
    %c0_i32 = arith.constant 0 : i32
    %c0_i32_0 = arith.constant 0 : i32
    return %arg0, %c0_i32, %arg1 : i32, i32, i32
  }
  func.func @transform_1(%arg0: i32, %arg1: i32) -> (i32, i32) {
    %c0_i32 = arith.constant 0 : i32
    %c0_i32_0 = arith.constant 0 : i32
    %c0_i32_1 = arith.constant 0 : i32
    return %c0_i32, %c0_i32_0 : i32, i32
  }
  func.func @transform_2(%arg0: i32, %arg1: i32) -> (i32, i32) {
    %c0_i32 = arith.constant 0 : i32
    %c0_i32_0 = arith.constant 0 : i32
    %c0_i32_1 = arith.constant 0 : i32
    return %c0_i32, %c0_i32_0 : i32, i32
  }
  func.func @transform_3(%arg0: i32, %arg1: i32) -> (i32, i32) {
    %c0_i32 = arith.constant 0 : i32
    %c0_i32_0 = arith.constant 0 : i32
    %c0_i32_1 = arith.constant 0 : i32
    return %c0_i32, %c0_i32_0 : i32, i32
  }
  func.func @transform_4(%arg0: i32, %arg1: i32) -> (i32, i32) {
    %c0_i32 = arith.constant 0 : i32
    %c0_i32_0 = arith.constant 0 : i32
    %c0_i32_1 = arith.constant 0 : i32
    return %c0_i32, %c0_i32_0 : i32, i32
  }
  func.func @transform_5(%arg0: i32, %arg1: i32) -> (i32, i32, i32) {
    %c0_i32 = arith.constant 0 : i32
    %c0_i32_0 = arith.constant 0 : i32
    return %arg0, %c0_i32, %arg1 : i32, i32, i32
  }
}

</mosaic_0001>

<bundles_post_ra>
// kernel: spatial_attention_2d.1
= control target key start
LH: loop header
LB: loop body
LE: loop exit
PB: predicated region body
PF: predicated region fallthrough
CT: control target
= control target key end

     0   :  { %s999_s20 = smov 0   ;;  %s1001_s21 = smov 0   ;;  %s1168_s0 = inlined_call_operand.vmem [shape: f32[2,4,256], index: 0, kind: input, shape index: {}]   ;;  %s1169_s1 = inlined_call_operand.vmem [shape: f32[128,4], index: 1, kind: input, shape index: {}]   ;;  %s1170_s2 = inlined_call_operand.vmem [shape: f32[128,1], index: 2, kind: input, shape index: {}]   ;;  %s1171_s3 = inlined_call_operand.vmem [shape: f32[1,128], index: 3, kind: input, shape index: {}]   ;;  %s1172_s4 = inlined_call_operand.<no memory space> [shape: f32[1,1], index: 4, kind: input, shape index: {}]   ;;  %s1173_s5 = inlined_call_operand.vmem [shape: f32[2,1,256], index: 5, kind: output, shape index: {}]  }
   0x1   :  { %v10_v0 = vstv %s1172_s4  ;;  %s1003_s22 = smov 0  }
   0x2   :  { %11 = vst [vmem:[#allocation2] sm:$0x1] %v10_v0 }
   0x3 LB: > { %s29_s4 = sadd.s32 1, %s957_s21  ;;  %p845_p0 = scmp.ge.s32.totalorder %s961_s22, 1  ;;  %s961_s22 = sphi %s1003_s22, %s17_s22   ;;  %s957_s21 = sphi %s1001_s21, %s1175_s21   ;;  %s953_s20 = sphi %s999_s20, %s1174_s20  }
   0x4   : > { %p31_p1 = scmp.ge.s32.totalorder %s29_s4, 2  ;;  %p210_p2 = scmp.lt.s32.totalorder %s961_s22, 3 }
   0x6   : > { %s1177_s4 = smov (%p31_p1, %s29_s4), 0  ;;  %p211_p3 = pnand %p845_p0, %p210_p2 }
   0x7   : > { %p246_p4 = scmp.lt.s32.totalorder (!%p211_p3), %s953_s20, 1  ;;  %v963_v1 = vmov (!%p211_p3), 0.0   ;;  %v964_v2 = vmov (!%p211_p3), 0   ;;  %v282_v3 = vld [vmem:[%s1170_s2] sm:$0xff] (!%p211_p3)  ;;  %v284_v5 = vld [vmem:[%s1170_s2 + $0x10] sm:$0xff] (!%p211_p3)  ;;  %v283_v7 = vld [vmem:[%s1170_s2 + $0x8] sm:$0xff] (!%p211_p3) }
   0x8   : > { %214 = sbr.rel (%p211_p3) target bundleno = 562 (0x232), region = 40  ;;  %498 = vmatprep.mubr.f32.mxu0 (!%p211_p3), %v963_v1  ;;  %702 = vmatprep.mubr.f32.mxu1 (!%p211_p3), %v963_v1  ;;  %vm429_vm0 = vcmask (!%p211_p3), 1043456   ;;  %v285_v8 = vld [vmem:[%s1170_s2 + $0x18] sm:$0xff] (!%p211_p3)  ;;  %v266_v10 = vld [vmem:[%s1169_s1] sm:$0xff] (!%p211_p3)  ;;  %vm380_vm1 = vcmask (!%p211_p3), 31744   ;;  %v287_v12 = vld [vmem:[%s1170_s2 + $0x28] sm:$0xff] (!%p211_p3) }
   0x9   : > { %929 = vset.pattern.permute.xlu0 (!%p211_p3), %v964_v2  ;;  %930 = vset.pattern.permute.xlu1 (!%p211_p3), %v964_v2  ;;  %v286_v11 = vld [vmem:[%s1170_s2 + $0x20] sm:$0xff] (!%p211_p3)  ;;  %v267_v13 = vld [vmem:[%s1169_s1 + $0x8] sm:$0xff] (!%p211_p3)  ;;  %v288_v14 = vld [vmem:[%s1170_s2 + $0x30] sm:$0xff] (!%p211_p3) }
   0xa   : > { %300 = vperm.xlu0 (!%p211_p3), %929, %v282_v3   ;;  %310 = vperm.xlu1 (!%p211_p3), %930, %v284_v5   ;;  %v289_v15 = vld [vmem:[%s1170_s2 + $0x38] sm:$0xff] (!%p211_p3)  ;;  %v268_v16 = vld [vmem:[%s1169_s1 + $0x10] sm:$0xff] (!%p211_p3)  ;;  %v290_v17 = vld [vmem:[%s1170_s2 + $0x40] sm:$0xff] (!%p211_p3) }
   0xb   : > { %v291_v18 = vld [vmem:[%s1170_s2 + $0x48] sm:$0xff] (!%p211_p3)  ;;  %v269_v19 = vld [vmem:[%s1169_s1 + $0x18] sm:$0xff] (!%p211_p3)  ;;  %v292_v20 = vld [vmem:[%s1170_s2 + $0x50] sm:$0xff] (!%p211_p3) }
   0xc   : > { %v293_v21 = vld [vmem:[%s1170_s2 + $0x58] sm:$0xff] (!%p211_p3)  ;;  %v270_v22 = vld [vmem:[%s1169_s1 + $0x20] sm:$0xff] (!%p211_p3)  ;;  %v295_v24 = vld [vmem:[%s1170_s2 + $0x68] sm:$0xff] (!%p211_p3) }
   0xd   : > { %v294_v23 = vld [vmem:[%s1170_s2 + $0x60] sm:$0xff] (!%p211_p3)  ;;  %v271_v25 = vld [vmem:[%s1169_s1 + $0x28] sm:$0xff] (!%p211_p3)  ;;  %v296_v26 = vld [vmem:[%s1170_s2 + $0x70] sm:$0xff] (!%p211_p3) }
   0xe   : > { %305 = vperm.xlu0 (!%p211_p3), %929, %v283_v7   ;;  %315 = vperm.xlu1 (!%p211_p3), %930, %v285_v8   ;;  %v297_v27 = vld [vmem:[%s1170_s2 + $0x78] sm:$0xff] (!%p211_p3)  ;;  %v272_v28 = vld [vmem:[%s1169_s1 + $0x30] sm:$0xff] (!%p211_p3)  ;;  %v628_v29 = vld [vmem:[#allocation2] sm:$0x1] (!%p211_p3) }
   0xf   : > { %s1179_s20 = smov (!%p246_p4, %s953_s20), 1  ;;  %v273_v30 = vld [vmem:[%s1169_s1 + $0x38] sm:$0xff]  ;;  %v274_v31 = vld [vmem:[%s1169_s1 + $0x40] sm:$0xff]  ;;  %v275_v32 = vld [vmem:[%s1169_s1 + $0x48] sm:$0xff] }
  0x10   : > { %s869_s23 = sshll.u32 %s1179_s20, 3  ;;  %v276_v33 = vld [vmem:[%s1169_s1 + $0x50] sm:$0xff]  ;;  %v277_v34 = vld [vmem:[%s1169_s1 + $0x58] sm:$0xff]  ;;  %v278_v35 = vld [vmem:[%s1169_s1 + $0x60] sm:$0xff]  ;;  %s848_s27 = sshll.u32 %s1179_s20, 1 }
  0x11   : > { %s253_s26 = scalar_lea.vmem %s1168_s0, %s869_s23  ;;  %v279_v36 = vld [vmem:[%s1169_s1 + $0x68] sm:$0xff]  ;;  %v280_v37 = vld [vmem:[%s1169_s1 + $0x70] sm:$0xff]  ;;  %v281_v38 = vld [vmem:[%s1169_s1 + $0x78] sm:$0xff]  ;;  %s262_s30 = scalar_lea.vmem %s1173_s5, %s848_s27 }
  0x12   : > { %v264_v4 = vld [vmem:[%s253_s26] sm:$0xff]  ;;  %320 = vperm.xlu0 %929, %v286_v11   ;;  %325 = vperm.xlu1 %930, %v287_v12  }
  0x13   : > { %v265_v6 = vmax.f32 %v264_v4, 0.0 }
  0x15   : > { %v379_v9 = vcombine.high %v265_v6, %v265_v6 }
  0x16   : > { %330 = vperm.xlu0 %929, %v288_v14   ;;  %335 = vperm.xlu1 %930, %v289_v15  }
  0x17   : > { %849 = vmatprep.subr.msk.mxu0 %vm429_vm0, %v379_v9 }
  0x18   : > { %850 = vmatpush1.msk.msra.mxu0 %vm429_vm0, %v265_v6 }
  0x19   : > { %851 = vmatmul.mubr.msk.f32.vlgmr.msra.gmra.mrb[0].mxu0 %vm380_vm1, %v266_v10 }
  0x1a   : > { %504 = vmatprep.mubr.f32.mxu0 %v963_v1  ;;  %340 = vperm.xlu0 %929, %v290_v17  }
  0x1b   : > { %345 = vperm.xlu1 %930, %v291_v18  }
  0x1d   : > { %852 = vmatmul.mubr.msk.f32.gmra.mrb[2].mxu0 %vm380_vm1, %v267_v13 }
  0x1e   : > { %510 = vmatprep.mubr.f32.mxu0 %v963_v1  ;;  %350 = vperm.xlu0 %929, %v292_v20  }
  0x1f   : > { %355 = vperm.xlu1 %930, %v293_v21  }
  0x21   : > { %853 = vmatmul.mubr.msk.f32.gmra.mrb[4].mxu0 %vm380_vm1, %v268_v16 }
  0x22   : > { %516 = vmatprep.mubr.f32.mxu0 %v963_v1  ;;  %360 = vperm.xlu0 %929, %v294_v23  }
  0x23   : > { %365 = vperm.xlu1 %930, %v295_v24  }
  0x25   : > { %854 = vmatmul.mubr.msk.f32.gmra.mrb[6].mxu0 %vm380_vm1, %v269_v19 }
  0x26   : > { %522 = vmatprep.mubr.f32.mxu0 %v963_v1  ;;  %370 = vperm.xlu0 %929, %v296_v26  }
  0x27   : > { %375 = vperm.xlu1 %930, %v297_v27  }
  0x29   : > { %855 = vmatmul.mubr.msk.f32.gmra.mrb[8].mxu0 %vm380_vm1, %v270_v22 }
  0x2a   : > { %528 = vmatprep.mubr.f32.mxu0 %v963_v1  ;;  %631 = vperm.xlu0 %929, %v628_v29  }
  0x2d   : > { %856 = vmatmul.mubr.msk.f32.gmra.mrb[10].mxu0 %vm380_vm1, %v271_v25 }
  0x2e   : > { %534 = vmatprep.mubr.f32.mxu0 %v963_v1 }
  0x31   : > { %857 = vmatmul.mubr.msk.f32.gmra.mrb[12].mxu0 %vm380_vm1, %v272_v28 }
  0x32   : > { %540 = vmatprep.mubr.f32.mxu0 %v963_v1 }
  0x35   : > { %858 = vmatmul.mubr.msk.f32.gmra.mrb[14].mxu0 %vm380_vm1, %v273_v30 }
  0x36   : > { %546 = vmatprep.mubr.f32.mxu0 %v963_v1 }
  0x39   : > { %859 = vmatmul.mubr.msk.f32.gmra.mrb[16].mxu0 %vm380_vm1, %v274_v31 }
  0x3a   : > { %552 = vmatprep.mubr.f32.mxu0 %v963_v1 }
  0x3d   : > { %860 = vmatmul.mubr.msk.f32.gmra.mrb[18].mxu0 %vm380_vm1, %v275_v32 }
  0x3e   : > { %558 = vmatprep.mubr.f32.mxu0 %v963_v1 }
  0x41   : > { %861 = vmatmul.mubr.msk.f32.gmra.mrb[20].mxu0 %vm380_vm1, %v276_v33 }
  0x42   : > { %564 = vmatprep.mubr.f32.mxu0 %v963_v1 }
  0x45   : > { %862 = vmatmul.mubr.msk.f32.gmra.mrb[22].mxu0 %vm380_vm1, %v277_v34 }
  0x46   : > { %570 = vmatprep.mubr.f32.mxu0 %v963_v1 }
  0x49   : > { %863 = vmatmul.mubr.msk.f32.gmra.mrb[24].mxu0 %vm380_vm1, %v278_v35 }
  0x4a   : > { %576 = vmatprep.mubr.f32.mxu0 %v963_v1 }
  0x4d   : > { %864 = vmatmul.mubr.msk.f32.gmra.mrb[26].mxu0 %vm380_vm1, %v279_v36 }
  0x4e   : > { %582 = vmatprep.mubr.f32.mxu0 %v963_v1 }
  0x51   : > { %865 = vmatmul.mubr.msk.f32.gmra.mrb[28].mxu0 %vm380_vm1, %v280_v37 }
  0x52   : > { %588 = vmatprep.mubr.f32.mxu0 %v963_v1 }
  0x55   : > { %866 = vmatmul.mubr.msk.f32.gmra.mrb[30].mxu0 %vm380_vm1, %v281_v38 }
  0x89   : > { %v301_v39 = vpop.permute.xlu0 %300  ;;  %v311_v48 = vpop.permute.xlu1 %310 }
  0x8d   : > { %v306_v43 = vpop.permute.xlu0 %305  ;;  %v316_v59 = vpop.permute.xlu1 %315 }
  0x91   : > { %v321_v8 = vpop.permute.xlu0 %320  ;;  %v326_v11 = vpop.permute.xlu1 %325 }
  0x95   : > { %v331_v24 = vpop.permute.xlu0 %330  ;;  %v336_v27 = vpop.permute.xlu1 %335 }
  0xec   : > { %v500_v40 = vpop.f32.mrb[0].mxu0 }
  0xed   : > { %v502_v41 = vpop.f32.mrb[1].mxu0  ;;  %v501_v42 = vadd.f32 %v500_v40, %v301_v39  ;;  %v341_v40 = vpop.permute.xlu0 %340 }
  0xee   : > { %v503_v44 = vadd.f32 %v502_v41, %v301_v39 }
  0xef   : > { %v595_v50 = vmax.f32 %v501_v42, 0.0 }
  0xf0   : > { %v506_v45 = vpop.f32.mrb[2].mxu0  ;;  %v596_v52 = vmax.f32 %v503_v44, 0.0 }
  0xf1   : > { %v507_v46 = vadd.f32 %v506_v45, %v306_v43  ;;  %v508_v47 = vpop.f32.mrb[3].mxu0 }
  0xf2   : > { %v509_v49 = vadd.f32 %v508_v47, %v306_v43  ;;  %v346_v43 = vpop.permute.xlu1 %345 }
  0xf3   : > { %v597_v51 = vmax.f32 %v507_v46, 0.0 }
  0xf4   : > { %v598_v53 = vmax.f32 %v509_v49, 0.0  ;;  %v512_v54 = vpop.f32.mrb[4].mxu0 }
  0xf5   : > { %v514_v55 = vpop.f32.mrb[5].mxu0  ;;  %v872_v56 = vpack.c.bf16 %v597_v51, %v595_v50  ;;  %v513_v58 = vadd.f32 %v512_v54, %v311_v48 }
  0xf6   : > { %v870_v57 = vpack.c.bf16 %v598_v53, %v596_v52  ;;  %v515_v60 = vadd.f32 %v514_v55, %v311_v48 }
  0xf7   : > { %v599_v1 = vmax.f32 %v513_v58, 0.0 }
  0xf8   : > { %v518_v61 = vpop.f32.mrb[6].mxu0  ;;  %871 = vmatprep.subr.bf16.mxu1 %v870_v57  ;;  %v600_v3 = vmax.f32 %v515_v60, 0.0 }
  0xf9   : > { %v519_v62 = vadd.f32 %v518_v61, %v316_v59  ;;  %v520_v63 = vpop.f32.mrb[7].mxu0  ;;  %873 = vmatpush1.bf16.msra.mxu1 %v872_v56  ;;  %v351_v56 = vpop.permute.xlu0 %350 }
  0xfa   : > { %v521_v0 = vadd.f32 %v520_v63, %v316_v59  ;;  %v356_v59 = vpop.permute.xlu1 %355 }
  0xfb   : > { %v601_v2 = vmax.f32 %v519_v62, 0.0 }
  0xfc   : > { %v602_v4 = vmax.f32 %v521_v0, 0.0  ;;  %v524_v5 = vpop.f32.mrb[8].mxu0 }
  0xfd   : > { %v876_v6 = vpack.c.bf16 %v601_v2, %v599_v1  ;;  %v526_v7 = vpop.f32.mrb[9].mxu0  ;;  %v525_v10 = vadd.f32 %v524_v5, %v321_v8 }
  0xfe   : > { %v874_v9 = vpack.c.bf16 %v602_v4, %v600_v3  ;;  %v527_v12 = vadd.f32 %v526_v7, %v321_v8  ;;  %v361_v8 = vpop.permute.xlu0 %360 }
  0xff   : > { %v603_v17 = vmax.f32 %v525_v10, 0.0 }
 0x100   : > { %v530_v13 = vpop.f32.mrb[10].mxu0  ;;  %875 = vmatprep.subr.bf16.mxu1 %v874_v9  ;;  %v604_v19 = vmax.f32 %v527_v12, 0.0 }
 0x101   : > { %v531_v14 = vadd.f32 %v530_v13, %v326_v11  ;;  %v532_v15 = vpop.f32.mrb[11].mxu0  ;;  %877 = vmatpush1.bf16.msra.mxu1 %v876_v6 }
 0x102   : > { %v533_v16 = vadd.f32 %v532_v15, %v326_v11  ;;  %v366_v11 = vpop.permute.xlu1 %365 }
 0x103   : > { %v605_v18 = vmax.f32 %v531_v14, 0.0 }
 0x104   : > { %v606_v20 = vmax.f32 %v533_v16, 0.0  ;;  %v536_v21 = vpop.f32.mrb[12].mxu0 }
 0x105   : > { %v880_v22 = vpack.c.bf16 %v605_v18, %v603_v17  ;;  %v538_v23 = vpop.f32.mrb[13].mxu0  ;;  %v537_v26 = vadd.f32 %v536_v21, %v331_v24 }
 0x106   : > { %v878_v25 = vpack.c.bf16 %v606_v20, %v604_v19  ;;  %v539_v28 = vadd.f32 %v538_v23, %v331_v24  ;;  %v371_v24 = vpop.permute.xlu0 %370 }
 0x107   : > { %v607_v33 = vmax.f32 %v537_v26, 0.0 }
 0x108   : > { %v542_v29 = vpop.f32.mrb[14].mxu0  ;;  %879 = vmatprep.subr.bf16.mxu1 %v878_v25  ;;  %v608_v35 = vmax.f32 %v539_v28, 0.0 }
 0x109   : > { %v543_v30 = vadd.f32 %v542_v29, %v336_v27  ;;  %v544_v31 = vpop.f32.mrb[15].mxu0  ;;  %881 = vmatpush1.bf16.msra.mxu1 %v880_v22 }
 0x10a   : > { %v545_v32 = vadd.f32 %v544_v31, %v336_v27  ;;  %v376_v27 = vpop.permute.xlu1 %375 }
 0x10b   : > { %v609_v34 = vmax.f32 %v543_v30, 0.0 }
 0x10c   : > { %v610_v36 = vmax.f32 %v545_v32, 0.0  ;;  %v548_v37 = vpop.f32.mrb[16].mxu0 }
 0x10d   : > { %v884_v38 = vpack.c.bf16 %v609_v34, %v607_v33  ;;  %v550_v39 = vpop.f32.mrb[17].mxu0  ;;  %v549_v42 = vadd.f32 %v548_v37, %v341_v40 }
 0x10e   : > { %v882_v41 = vpack.c.bf16 %v610_v36, %v608_v35  ;;  %v551_v44 = vadd.f32 %v550_v39, %v341_v40  ;;  %v627_v39 = vld [vmem:[%s1171_s3] sm:$0x1]  ;;  %v634_v40 = vlaneseq }
 0x10f   : > { %v611_v49 = vmax.f32 %v549_v42, 0.0 }
 0x110   : > { %v554_v45 = vpop.f32.mrb[18].mxu0  ;;  %883 = vmatprep.subr.bf16.mxu1 %v882_v41  ;;  %v612_v51 = vmax.f32 %v551_v44, 0.0  ;;  %v635_v41 = vshrl.u32 %v634_v40, 7  ;;  %vm757_vm6 = vcmp.lt.s32.totalorder %v634_v40, 256 }
 0x111   : > { %v555_v46 = vadd.f32 %v554_v45, %v346_v43  ;;  %v556_v47 = vpop.f32.mrb[19].mxu0  ;;  %885 = vmatpush1.bf16.msra.mxu1 %v884_v38 }
 0x112   : > { %v557_v48 = vadd.f32 %v556_v47, %v346_v43  ;;  %v636_v42 = vsub.s32 0, %v635_v41  ;;  %v632_v43 = vpop.permute.xlu0 %631 }
 0x113   : > { %v613_v50 = vmax.f32 %v555_v46, 0.0 }
 0x114   : > { %v614_v52 = vmax.f32 %v557_v48, 0.0  ;;  %v560_v53 = vpop.f32.mrb[20].mxu0  ;;  %v637_v44 = vrot.slane %v632_v43, %v636_v42 }
 0x115   : > { %v888_v54 = vpack.c.bf16 %v613_v50, %v611_v49  ;;  %v562_v55 = vpop.f32.mrb[21].mxu0  ;;  %v561_v58 = vadd.f32 %v560_v53, %v351_v56 }
 0x116   : > { %v886_v57 = vpack.c.bf16 %v614_v52, %v612_v51  ;;  %v563_v60 = vadd.f32 %v562_v55, %v351_v56 }
 0x117   : > { %v615_v1 = vmax.f32 %v561_v58, 0.0 }
 0x118   : > { %v566_v61 = vpop.f32.mrb[22].mxu0  ;;  %887 = vmatprep.subr.bf16.mxu1 %v886_v57  ;;  %v616_v3 = vmax.f32 %v563_v60, 0.0 }
 0x119   : > { %v567_v62 = vadd.f32 %v566_v61, %v356_v59  ;;  %v568_v63 = vpop.f32.mrb[23].mxu0  ;;  %889 = vmatpush1.bf16.msra.mxu1 %v888_v54 }
 0x11a   : > { %v569_v0 = vadd.f32 %v568_v63, %v356_v59  ;;  %v965_v59 = vmov 1966171168  }
 0x11b   : > { %v617_v2 = vmax.f32 %v567_v62, 0.0  ;;  %v741_v60 = vunpack.c.l.s4 %v965_v59 }
 0x11c   : > { %v618_v4 = vmax.f32 %v569_v0, 0.0  ;;  %v572_v5 = vpop.f32.mrb[24].mxu0 }
 0x11d   : > { %v892_v6 = vpack.c.bf16 %v617_v2, %v615_v1  ;;  %v574_v7 = vpop.f32.mrb[25].mxu0  ;;  %v573_v10 = vadd.f32 %v572_v5, %v361_v8  ;;  %v742_v2 = vunpack.c.0.s8 %v741_v60 }
 0x11e   : > { %v890_v9 = vpack.c.bf16 %v618_v4, %v616_v3  ;;  %v575_v12 = vadd.f32 %v574_v7, %v361_v8 }
 0x11f   : > { %v619_v17 = vmax.f32 %v573_v10, 0.0 }
 0x120   : > { %v578_v13 = vpop.f32.mrb[26].mxu0  ;;  %891 = vmatprep.subr.bf16.mxu1 %v890_v9  ;;  %v620_v19 = vmax.f32 %v575_v12, 0.0  ;;  %v745_v9 = vsub.s32 %v742_v2, %v635_v41 }
 0x121   : > { %v579_v14 = vadd.f32 %v578_v13, %v366_v11  ;;  %v580_v15 = vpop.f32.mrb[27].mxu0  ;;  %893 = vmatpush1.bf16.msra.mxu1 %v892_v6 }
 0x122   : > { %v581_v16 = vadd.f32 %v580_v15, %v366_v11 }
 0x123   : > { %v621_v18 = vmax.f32 %v579_v14, 0.0 }
 0x124   : > { %v622_v20 = vmax.f32 %v581_v16, 0.0  ;;  %v584_v21 = vpop.f32.mrb[28].mxu0 }
 0x125   : > { %v896_v22 = vpack.c.bf16 %v621_v18, %v619_v17  ;;  %v586_v23 = vpop.f32.mrb[29].mxu0  ;;  %v585_v26 = vadd.f32 %v584_v21, %v371_v24 }
 0x126   : > { %v894_v25 = vpack.c.bf16 %v622_v20, %v620_v19  ;;  %v587_v28 = vadd.f32 %v586_v23, %v371_v24 }
 0x127   : > { %v623_v33 = vmax.f32 %v585_v26, 0.0 }
 0x128   : > { %v590_v29 = vpop.f32.mrb[30].mxu0  ;;  %895 = vmatprep.subr.bf16.mxu1 %v894_v25  ;;  %v624_v35 = vmax.f32 %v587_v28, 0.0 }
 0x129   : > { %v591_v30 = vadd.f32 %v590_v29, %v376_v27  ;;  %v592_v31 = vpop.f32.mrb[31].mxu0  ;;  %897 = vmatpush1.bf16.msra.mxu1 %v896_v22 }
 0x12a   : > { %v593_v32 = vadd.f32 %v592_v31, %v376_v27 }
 0x12b   : > { %v625_v34 = vmax.f32 %v591_v30, 0.0 }
 0x12c   : > { %v626_v36 = vmax.f32 %v593_v32, 0.0 }
 0x12d   : > { %v900_v37 = vpack.c.bf16 %v625_v34, %v623_v33 }
 0x12e   : > { %v898_v38 = vpack.c.bf16 %v626_v36, %v624_v35 }
 0x130   : > { %899 = vmatprep.subr.bf16.mxu1 %v898_v38 }
 0x131   : > { %901 = vmatpush1.bf16.msra.mxu1 %v900_v37 }
 0x134   : > { %703 = vmatmul.mubr.f32.vlgmr.msra.gmra.mrb[0].mxu1 %v627_v39 }
 0x207   : > { %v704_v45 = vpop.f32.mrb[0].mxu1 }
 0x208   : > { %v705_v46 = vadd.f32 %v704_v45, %v637_v44  ;;  %v706_v47 = vpop.f32.mrb[1].mxu1 }
 0x209   : > { %v707_v48 = vadd.f32 %v706_v47, %v637_v44 }
 0x20a   : > { %v709_v49 = vmin.f32 %v705_v46, 20.0  ;;  %vm733_vm3 = vcmp.gt.f32.partialorder %v705_v46, 20.0 }
 0x20b   : > { %v710_v50 = vmin.f32 %v707_v48, 20.0  ;;  %vm734_vm5 = vcmp.gt.f32.partialorder %v707_v48, 20.0 }
 0x20c   : > { %v711_v51 = vmul.f32 1.442695, %v709_v49 }
 0x20d   : > { %v713_v52 = vmul.f32 1.442695, %v710_v50 }
 0x20e   : > { %931 = vpow2.f32 %v711_v51 }
 0x20f   : > { %933 = vpow2.f32 %v713_v52 }
 0x218   : > { %v932_v53 = vpop.eup %931 }
 0x219   : > { %v934_v54 = vpop.eup %933  ;;  %v715_v55 = vadd.f32 1.0, %v932_v53  ;;  %v718_v57 = vmul.f32 -0.5, %v932_v53  ;;  %v721_v62 = vand.u32 2147483647, %v932_v53 }
 0x21a   : > { %v724_v56 = vadd.f32 1.0, %v934_v54  ;;  %v727_v58 = vmul.f32 -0.5, %v934_v54  ;;  %v730_v0 = vand.u32 2147483647, %v934_v54 }
 0x21b   : > { %935 = vlog2.f32 %v715_v55  ;;  %v719_v61 = vadd.f32 1.0, %v718_v57  ;;  %vm722_vm2 = vcmp.lt.f32.partialorder %v721_v62, 0.0004427343 }
 0x21c   : > { %937 = vlog2.f32 %v724_v56  ;;  %v728_v63 = vadd.f32 1.0, %v727_v58  ;;  %vm731_vm4 = vcmp.lt.f32.partialorder %v730_v0, 0.0004427343 }
 0x21d   : > { %v720_v5 = vmul.f32 %v932_v53, %v719_v61 }
 0x21e   : > { %v729_v7 = vmul.f32 %v934_v54, %v728_v63 }
 0x225   : > { %v936_v1 = vpop.eup %935 }
 0x226   : > { %v938_v3 = vpop.eup %937  ;;  %v717_v4 = vmul.f32 0.6931472, %v936_v1 }
 0x227   : > { %v726_v6 = vmul.f32 0.6931472, %v938_v3 }
 0x228   : > { %v723_v8 = vsel %vm722_vm2, %v720_v5, %v717_v4 }
 0x229   : > { %v735_v10 = vsel %vm733_vm3, %v705_v46, %v723_v8  ;;  %v732_v11 = vsel %vm731_vm4, %v729_v7, %v726_v6 }
 0x22a   : > { %v736_v12 = vsel %vm734_vm5, %v707_v48, %v732_v11 }
 0x22b   : > { %v739_v13 = vcombine.low %v735_v10, %v736_v12 }
 0x22d   : > { %v746_v14 = vrot.slane %v739_v13, %v745_v9 }
 0x22f   : > { %v753_v15 = vrot.slane %v746_v14, %v745_v9 }
 0x231   : > { %759 = vst.msk [vmem:[%s262_s30] sm:$0x3] %vm757_vm6, %v753_v15 }
 0x232 PF: > { %s17_s22 = sadd.s32 1, %s961_s22   ;;  %s1174_s20 = smov %s957_s21 }
 0x233   : > { %p14_p5 = scmp.ge.s32.totalorder %s17_s22, 4   ;;  %s1175_s21 = smov %s1177_s4 }
 0x235   :  { %16 = sbr.rel (!%p14_p5) target bundleno = 3 (0x3), region = 70 }

</bundles_post_ra>
